<compile_context>
chip_gen: v5e
topology: v5e:2x2
jax: 0.10.0
libtpu: 0.0.40
codegen_flags: <defaults>
</compile_context>

<pallas_src>
import functools

import jax
import jax.numpy as jnp
from jax.experimental import pallas as pl
from jax.experimental.pallas import tpu as pltpu


# VMEM budget for the streaming (double-buffered) blocks of each pass, and the
# scoped-VMEM limit handed to Mosaic.  40 MiB is safe on every generation
# (v5e/v6e: 128 MiB physical, v7x: 64 MiB physical) while being well above the
# 16/32 MiB default scoped limits.
_STREAM_VMEM_BUDGET = 24 * 1024 * 1024
_VMEM_LIMIT_BYTES = 40 * 1024 * 1024


def _pick_s_tile(S, bytes_per_lane, budget_bytes, cap):
    """Largest lane-dense spatial tile fitting the streaming VMEM budget.

    bytes_per_lane: VMEM bytes consumed per lane of S per grid step (counting
    double buffering of all streamed operands).  Returns S itself (full
    extent, always a legal block shape) when it fits, otherwise a multiple of
    128 (lane constraint), so arbitrary caps never violate the (8,128) rule.
    """
    if S <= cap and S * bytes_per_lane <= budget_bytes:
        return int(S)
    tile = min(cap, budget_bytes // bytes_per_lane, S)
    tile = max(128, (tile // 128) * 128)
    return int(tile)


# ---------------------------------------------------------------------------
# Pass 1 (fused): spatial sums + 4C->128->1 MLP + sigmoid.
# ---------------------------------------------------------------------------
def _reduce_mlp_kernel(infor_ref, all_ref, w1i_ref, w1a_ref, b1_ref, w2t_ref,
                       b2_ref, wgt_ref, inf_sum, all_sum, *, S, S_TILE):
    """Grid (B, nS).  Per step:
         infor_ref: (1, C,  S_TILE)   all_ref: (1, 3C, S_TILE)
         w1i_ref: (hid, C)  w1a_ref: (hid, 3C)  b1_ref: (hid, 1)
         w2t_ref: (1, hid)  b2_ref: (1, 1)      (all resident, constant maps)
         wgt_ref: (1, 1, 1) f32 output, written only on the last S step.
         inf_sum: (C, 1) f32 scratch, all_sum: (3C, 1) f32 scratch.
    """
    s = pl.program_id(1)
    n_s = pl.num_programs(1)

    @pl.when(s == 0)
    def _init():
        inf_sum[...] = jnp.zeros_like(inf_sum)
        all_sum[...] = jnp.zeros_like(all_sum)

    inf = infor_ref[0].astype(jnp.float32)      # (C,  S_TILE)
    al = all_ref[0].astype(jnp.float32)         # (3C, S_TILE)

    if S % S_TILE == 0:
        # No partial tile anywhere: plain unmasked accumulate.
        inf_sum[...] += jnp.sum(inf, axis=-1, keepdims=True)
        all_sum[...] += jnp.sum(al, axis=-1, keepdims=True)
    else:
        # Only the last tile overhangs S; mask it there and nowhere else.
        @pl.when(s != n_s - 1)
        def _full_tile():
            inf_sum[...] += jnp.sum(inf, axis=-1, keepdims=True)
            all_sum[...] += jnp.sum(al, axis=-1, keepdims=True)

        @pl.when(s == n_s - 1)
        def _tail_tile():
            lane = jax.lax.broadcasted_iota(jnp.int32, (1, S_TILE), 1)
            valid = (s * S_TILE + lane) < S
            inf_sum[...] += jnp.sum(jnp.where(valid, inf, 0.0),
                                    axis=-1, keepdims=True)
            all_sum[...] += jnp.sum(jnp.where(valid, al, 0.0),
                                    axis=-1, keepdims=True)

    @pl.when(s == n_s - 1)
    def _finalize():
        inv_s = 1.0 / S                         # divide by the true S once
        inf_mean = inf_sum[...] * inv_s         # (C, 1)
        all_mean = all_sum[...] * inv_s         # (3C, 1)
        # Column-oriented matvecs: W1^T is pre-split into the infor/all halves
        # in the wrapper, so no concat / transpose of the means is needed.
        h = (jnp.dot(w1i_ref[...], inf_mean, preferred_element_type=jnp.float32)
             + jnp.dot(w1a_ref[...], all_mean, preferred_element_type=jnp.float32)
             + b1_ref[...])                     # (hid, 1)
        h = jnp.where(h > 0, h, 0.2 * h)        # LeakyReLU(0.2)
        logit = (jnp.dot(w2t_ref[...], h, preferred_element_type=jnp.float32)
                 + b2_ref[...])                 # (1, 1)
        wgt_ref[0] = 1.0 / (1.0 + jnp.exp(-logit))   # sigmoid


# ---------------------------------------------------------------------------
# Pass 2: streaming scale  out[b] = infor[b] * w[b].
# ---------------------------------------------------------------------------
def _scale_kernel(wgt_ref, infor_ref, out_ref):
    """Grid (B, nS).  wgt_ref: (B,) f32 in SMEM.  infor/out: (1, C, S_TILE)."""
    b = pl.program_id(0)
    w = wgt_ref[b]                              # scalar load from SMEM
    x = infor_ref[...]
    if x.dtype == jnp.float32:
        out_ref[...] = x * w
    else:
        # Low-precision inputs (e.g. bf16): multiply in the native dtype to
        # halve vreg traffic on v6e/v7x (pass is HBM-bound either way).
        out_ref[...] = (x * w.astype(x.dtype)).astype(out_ref.dtype)


@functools.partial(jax.jit, static_argnames=("reduce_tile_cap", "scale_tile_cap"))
def att_forward(infor, all_, w1, b1, w2, b2, *,
                reduce_tile_cap=65536, scale_tile_cap=262144):
    """infor: (B, C, H, W, Z); all_: (B, 3C, H, W, Z).

    Parameters of the two 1x1x1 Conv3d layers, stored as dense (in, out)
    matrices (i.e. torch weight.squeeze(-1,-2,-3).T):
      w1: (4C, hid), b1: (hid,), w2: (hid, 1), b2: (1,)
    """
    B, C, H, W, Z = infor.shape
    C3 = all_.shape[1]
    hid = w1.shape[1]
    S = H * W * Z

    # Layout-preserving collapse of the spatial dims (no data movement).
    infor_f = infor.reshape(B, C, S)
    all_f = all_.reshape(B, C3, S)

    in_item = jnp.dtype(infor.dtype).itemsize
    all_item = jnp.dtype(all_.dtype).itemsize

    # Per-pass lane-dense tile sizes from the VMEM budget (double-buffered).
    s_tile_r = _pick_s_tile(S, 2 * (C * in_item + C3 * all_item),
                            _STREAM_VMEM_BUDGET, cap=reduce_tile_cap)
    s_tile_w = _pick_s_tile(S, 2 * (C * in_item + C * in_item),
                            _STREAM_VMEM_BUDGET, cap=scale_tile_cap)
    n_sr = pl.cdiv(S, s_tile_r)
    n_sw = pl.cdiv(S, s_tile_w)

    # MLP parameters, column-oriented and split into infor / all halves so the
    # kernel needs no concat or transpose of the accumulated means.
    w1t = w1.astype(jnp.float32).T               # (hid, 4C)
    w1t_inf = w1t[:, :C]                         # (hid, C)
    w1t_all = w1t[:, C:]                         # (hid, 3C)
    b1c = b1.astype(jnp.float32).reshape(hid, 1)
    w2t = w2.astype(jnp.float32).reshape(1, hid)
    b2c = b2.astype(jnp.float32).reshape(1, 1)

    # ---- Pass 1 (fused reduce + MLP) -> per-batch weight (B, 1, 1) ----------
    wgt = pl.pallas_call(
        functools.partial(_reduce_mlp_kernel, S=S, S_TILE=s_tile_r),
        out_shape=jax.ShapeDtypeStruct((B, 1, 1), jnp.float32),
        grid=(B, n_sr),
        in_specs=[
            pl.BlockSpec((1, C, s_tile_r), lambda b, s: (b, 0, s)),
            pl.BlockSpec((1, C3, s_tile_r), lambda b, s: (b, 0, s)),
            pl.BlockSpec((hid, C), lambda b, s: (0, 0)),     # resident weights
            pl.BlockSpec((hid, C3), lambda b, s: (0, 0)),
            pl.BlockSpec((hid, 1), lambda b, s: (0, 0)),
            pl.BlockSpec((1, hid), lambda b, s: (0, 0)),
            pl.BlockSpec((1, 1), lambda b, s: (0, 0)),
        ],
        out_specs=pl.BlockSpec((1, 1, 1), lambda b, s: (b, 0, 0)),
        scratch_shapes=[
            pltpu.VMEM((C, 1), jnp.float32),
            pltpu.VMEM((C3, 1), jnp.float32),
        ],
        compiler_params=pltpu.CompilerParams(
            dimension_semantics=("parallel", "arbitrary"),
            vmem_limit_bytes=_VMEM_LIMIT_BYTES),
    )(infor_f, all_f, w1t_inf, w1t_all, b1c, w2t, b2c)
    wgt1d = wgt.reshape(B)

    # ---- Pass 2: streaming scale --------------------------------------------
    out = pl.pallas_call(
        _scale_kernel,
        out_shape=jax.ShapeDtypeStruct((B, C, S), infor.dtype),
        grid=(B, n_sw),
        in_specs=[
            pl.BlockSpec(memory_space=pltpu.MemorySpace.SMEM),   # wgt (B,) scalars
            pl.BlockSpec((1, C, s_tile_w), lambda b, s: (b, 0, s)),
        ],
        out_specs=pl.BlockSpec((1, C, s_tile_w), lambda b, s: (b, 0, s)),
        compiler_params=pltpu.CompilerParams(
            dimension_semantics=("parallel", "parallel"),
            vmem_limit_bytes=_VMEM_LIMIT_BYTES),
    )(wgt1d, infor_f)

    return out.reshape(B, C, H, W, Z)


def _reference(infor, all_, w1, b1, w2, b2):
    B = infor.shape[0]
    infor_avg = jnp.mean(infor, axis=(2, 3, 4))            # (B, C)
    all_avg = jnp.mean(all_, axis=(2, 3, 4))                # (B, 3C)
    x = jnp.concatenate([infor_avg, all_avg], axis=1)       # (B, 4C)
    h = x @ w1 + b1
    h = jnp.where(h > 0, h, 0.2 * h)
    logit = h @ w2 + b2.reshape(1, 1)                       # (B, 1)
    wgt = jax.nn.sigmoid(logit).reshape(B, 1, 1, 1, 1)
    return infor * wgt


if __name__ == "__main__":
    # Module default in_channel=8 -> C=8.  Spatial extent 8*8*9 = 576.
    B, C, H, W, Z = 2, 8, 8, 8, 9
    key = jax.random.PRNGKey(0)
    k_inf, k_all, k_w1, k_b1, k_w2, k_b2 = jax.random.split(key, 6)

    infor = jax.random.normal(k_inf, (B, C, H, W, Z), dtype=jnp.float32)
    all_ = jax.random.normal(k_all, (B, 3 * C, H, W, Z), dtype=jnp.float32)

    # Conv3d(4C,128,1) / Conv3d(128,1,1) parameters, stored pre-transposed as
    # dense (in, out) matrices (== torch weight.squeeze(-1,-2,-3).T).
    w1 = 0.1 * jax.random.normal(k_w1, (4 * C, 128), dtype=jnp.float32)
    b1 = 0.1 * jax.random.normal(k_b1, (128,), dtype=jnp.float32)
    w2 = 0.1 * jax.random.normal(k_w2, (128, 1), dtype=jnp.float32)
    b2 = 0.1 * jax.random.normal(k_b2, (1,), dtype=jnp.float32)

    ref = _reference(infor, all_, w1, b1, w2, b2)

    # Default (large-cap) tiling: single full-extent spatial tile at this size.
    out = att_forward(infor, all_, w1, b1, w2, b2)
    out = jax.block_until_ready(out)
    assert out.shape == (B, C, H, W, Z)
    assert jnp.allclose(out, ref, atol=1e-5, rtol=1e-5)

    # Small caps force multi-tile streaming AND the masked partial last tile.
    out2 = att_forward(infor, all_, w1, b1, w2, b2,
                       reduce_tile_cap=256, scale_tile_cap=256)
    out2 = jax.block_until_ready(out2)
    assert jnp.allclose(out2, ref, atol=1e-5, rtol=1e-5)

    print("KERNEL_OK")
</pallas_src>

<mosaic_0001>
module attributes {stable_mosaic.version = 11 : i64} {
  func.func @_reduce_mlp_kernel(%arg0: i32, %arg1: i32, %arg2: memref<1x8x576xf32, #tpu.memory_space<vmem>>, %arg3: memref<1x24x576xf32, #tpu.memory_space<vmem>>, %arg4: memref<128x8xf32, #tpu.memory_space<vmem>>, %arg5: memref<128x24xf32, #tpu.memory_space<vmem>>, %arg6: memref<128x1xf32, #tpu.memory_space<vmem>>, %arg7: memref<1x128xf32, #tpu.memory_space<vmem>>, %arg8: memref<1x1xf32, #tpu.memory_space<vmem>>, %arg9: memref<1x1x1xf32, #tpu.memory_space<vmem>>, %arg10: memref<8x1xf32, #tpu.memory_space<vmem>>, %arg11: memref<24x1xf32, #tpu.memory_space<vmem>>) attributes {dimension_semantics = [#tpu.dimension_semantics<parallel>, #tpu.dimension_semantics<arbitrary>], iteration_bounds = array<i64: 2, 1>, scalar_prefetch = 0 : i64, scratch_operands = 2 : i64, tpu.core_type = #tpu.core_type<tc>, window_params = [{transform_indices = @transform_0, window_bounds = array<i64: 1, 8, 576>}, {transform_indices = @transform_1, window_bounds = array<i64: 1, 24, 576>}, {pipeline_mode = #tpu.pipeline_mode<synchronous>, transform_indices = @transform_2, window_bounds = array<i64: 128, 8>}, {pipeline_mode = #tpu.pipeline_mode<synchronous>, transform_indices = @transform_3, window_bounds = array<i64: 128, 24>}, {pipeline_mode = #tpu.pipeline_mode<synchronous>, transform_indices = @transform_4, window_bounds = array<i64: 128, 1>}, {pipeline_mode = #tpu.pipeline_mode<synchronous>, transform_indices = @transform_5, window_bounds = array<i64: 1, 128>}, {pipeline_mode = #tpu.pipeline_mode<synchronous>, transform_indices = @transform_6, window_bounds = array<i64: 1, 1>}, {transform_indices = @transform_7, window_bounds = array<i64: 1, 1, 1>}]} {
    %c0_i32 = arith.constant 0 : i32
    %0 = arith.cmpi eq, %arg1, %c0_i32 : i32
    %1 = arith.extui %0 : i1 to i32
    %c0_i32_0 = arith.constant 0 : i32
    %2 = arith.cmpi ne, %1, %c0_i32_0 : i32
    scf.if %2 {
      %cst_17 = arith.constant 0.000000e+00 : f32
      %20 = vector.broadcast %cst_17 : f32 to vector<8x1xf32>
      %c0_18 = arith.constant 0 : index
      %c0_19 = arith.constant 0 : index
      %21 = vector.load %arg10[%c0_18, %c0_19] : memref<8x1xf32, #tpu.memory_space<vmem>>, vector<8x1xf32>
      tpu.vector_store %arg10[%c0_18, %c0_19], %20 {strides = array<i32>} : memref<8x1xf32, #tpu.memory_space<vmem>>, vector<8x1xf32>,
      %cst_20 = arith.constant 0.000000e+00 : f32
      %22 = vector.broadcast %cst_20 : f32 to vector<24x1xf32>
      %c0_21 = arith.constant 0 : index
      %c0_22 = arith.constant 0 : index
      %23 = vector.load %arg11[%c0_21, %c0_22] : memref<24x1xf32, #tpu.memory_space<vmem>>, vector<24x1xf32>
      tpu.vector_store %arg11[%c0_21, %c0_22], %22 {strides = array<i32>} : memref<24x1xf32, #tpu.memory_space<vmem>>, vector<24x1xf32>,
    } else {
    }
    %c0 = arith.constant 0 : index
    %c0_1 = arith.constant 0 : index
    %c0_2 = arith.constant 0 : index
    %3 = vector.load %arg2[%c0, %c0_1, %c0_2] : memref<1x8x576xf32, #tpu.memory_space<vmem>>, vector<1x8x576xf32>
    %4 = vector.shape_cast %3 : vector<1x8x576xf32> to vector<8x576xf32>
    %c0_3 = arith.constant 0 : index
    %c0_4 = arith.constant 0 : index
    %c0_5 = arith.constant 0 : index
    %5 = vector.load %arg3[%c0_3, %c0_4, %c0_5] : memref<1x24x576xf32, #tpu.memory_space<vmem>>, vector<1x24x576xf32>
    %6 = vector.shape_cast %5 : vector<1x24x576xf32> to vector<24x576xf32>
    %c0_6 = arith.constant 0 : index
    %c0_7 = arith.constant 0 : index
    %7 = vector.load %arg10[%c0_6, %c0_7] : memref<8x1xf32, #tpu.memory_space<vmem>>, vector<8x1xf32>
    %cst = arith.constant dense<0.000000e+00> : vector<8xf32>
    %8 = vector.multi_reduction <add>, %4, %cst [1] : vector<8x576xf32> to vector<8xf32>
    %9 = vector.shape_cast %8 : vector<8xf32> to vector<8x1xf32>
    %10 = arith.addf %7, %9 : vector<8x1xf32>
    %c0_8 = arith.constant 0 : index
    %c0_9 = arith.constant 0 : index
    %11 = vector.load %arg10[%c0_8, %c0_9] : memref<8x1xf32, #tpu.memory_space<vmem>>, vector<8x1xf32>
    tpu.vector_store %arg10[%c0_8, %c0_9], %10 {strides = array<i32>} : memref<8x1xf32, #tpu.memory_space<vmem>>, vector<8x1xf32>,
    %c0_10 = arith.constant 0 : index
    %c0_11 = arith.constant 0 : index
    %12 = vector.load %arg11[%c0_10, %c0_11] : memref<24x1xf32, #tpu.memory_space<vmem>>, vector<24x1xf32>
    %cst_12 = arith.constant dense<0.000000e+00> : vector<24xf32>
    %13 = vector.multi_reduction <add>, %6, %cst_12 [1] : vector<24x576xf32> to vector<24xf32>
    %14 = vector.shape_cast %13 : vector<24xf32> to vector<24x1xf32>
    %15 = arith.addf %12, %14 : vector<24x1xf32>
    %c0_13 = arith.constant 0 : index
    %c0_14 = arith.constant 0 : index
    %16 = vector.load %arg11[%c0_13, %c0_14] : memref<24x1xf32, #tpu.memory_space<vmem>>, vector<24x1xf32>
    tpu.vector_store %arg11[%c0_13, %c0_14], %15 {strides = array<i32>} : memref<24x1xf32, #tpu.memory_space<vmem>>, vector<24x1xf32>,
    %c0_i32_15 = arith.constant 0 : i32
    %17 = arith.cmpi eq, %arg1, %c0_i32_15 : i32
    %18 = arith.extui %17 : i1 to i32
    %c0_i32_16 = arith.constant 0 : i32
    %19 = arith.cmpi ne, %18, %c0_i32_16 : i32
    scf.if %19 {
      %c0_17 = arith.constant 0 : index
      %c0_18 = arith.constant 0 : index
      %20 = vector.load %arg10[%c0_17, %c0_18] : memref<8x1xf32, #tpu.memory_space<vmem>>, vector<8x1xf32>
      %cst_19 = arith.constant 0.00173611112 : f32
      %21 = vector.broadcast %cst_19 : f32 to vector<8x1xf32>
      %22 = arith.mulf %20, %21 : vector<8x1xf32>
      %c0_20 = arith.constant 0 : index
      %c0_21 = arith.constant 0 : index
      %23 = vector.load %arg11[%c0_20, %c0_21] : memref<24x1xf32, #tpu.memory_space<vmem>>, vector<24x1xf32>
      %cst_22 = arith.constant 0.00173611112 : f32
      %24 = vector.broadcast %cst_22 : f32 to vector<24x1xf32>
      %25 = arith.mulf %23, %24 : vector<24x1xf32>
      %c0_23 = arith.constant 0 : index
      %c0_24 = arith.constant 0 : index
      %26 = vector.load %arg4[%c0_23, %c0_24] : memref<128x8xf32, #tpu.memory_space<vmem>>, vector<128x8xf32>
      %cst_25 = arith.constant dense<0.000000e+00> : vector<128x1xf32>
      %27 = tpu.matmul %26, %22, %cst_25 {dimension_numbers = #tpu.dot_dimension_numbers<[1], [0], [0], [1], [0, 0, 1, 1], [], []>} : vector<128x8xf32>, vector<8x1xf32>, vector<128x1xf32> -> vector<128x1xf32>
      %c0_26 = arith.constant 0 : index
      %c0_27 = arith.constant 0 : index
      %28 = vector.load %arg5[%c0_26, %c0_27] : memref<128x24xf32, #tpu.memory_space<vmem>>, vector<128x24xf32>
      %cst_28 = arith.constant dense<0.000000e+00> : vector<128x1xf32>
      %29 = tpu.matmul %28, %25, %cst_28 {dimension_numbers = #tpu.dot_dimension_numbers<[1], [0], [0], [1], [0, 0, 1, 1], [], []>} : vector<128x24xf32>, vector<24x1xf32>, vector<128x1xf32> -> vector<128x1xf32>
      %30 = arith.addf %27, %29 : vector<128x1xf32>
      %c0_29 = arith.constant 0 : index
      %c0_30 = arith.constant 0 : index
      %31 = vector.load %arg6[%c0_29, %c0_30] : memref<128x1xf32, #tpu.memory_space<vmem>>, vector<128x1xf32>
      %32 = arith.addf %30, %31 : vector<128x1xf32>
      %cst_31 = arith.constant 0.000000e+00 : f32
      %33 = vector.broadcast %cst_31 : f32 to vector<128x1xf32>
      %34 = arith.cmpf ogt, %32, %33 : vector<128x1xf32>
      %cst_32 = arith.constant 2.000000e-01 : f32
      %35 = vector.broadcast %cst_32 : f32 to vector<128x1xf32>
      %36 = arith.mulf %35, %32 : vector<128x1xf32>
      %37 = arith.select %34, %32, %36 : vector<128x1xi1>, vector<128x1xf32>
      %c0_33 = arith.constant 0 : index
      %c0_34 = arith.constant 0 : index
      %38 = vector.load %arg7[%c0_33, %c0_34] : memref<1x128xf32, #tpu.memory_space<vmem>>, vector<1x128xf32>
      %cst_35 = arith.constant dense<0.000000e+00> : vector<1x1xf32>
      %39 = tpu.matmul %38, %37, %cst_35 {dimension_numbers = #tpu.dot_dimension_numbers<[1], [0], [0], [1], [0, 0, 1, 1], [], []>} : vector<1x128xf32>, vector<128x1xf32>, vector<1x1xf32> -> vector<1x1xf32>
      %c0_36 = arith.constant 0 : index
      %c0_37 = arith.constant 0 : index
      %40 = vector.load %arg8[%c0_36, %c0_37] : memref<1x1xf32, #tpu.memory_space<vmem>>, vector<1x1xf32>
      %41 = arith.addf %39, %40 : vector<1x1xf32>
      %cst_38 = arith.constant 0.000000e+00 : f32
      %42 = vector.broadcast %cst_38 : f32 to vector<1x1xf32>
      %43 = arith.subf %42, %41 : vector<1x1xf32>
      %44 = math.exp %43 : vector<1x1xf32>
      %cst_39 = arith.constant 1.000000e+00 : f32
      %45 = vector.broadcast %cst_39 : f32 to vector<1x1xf32>
      %46 = arith.addf %45, %44 : vector<1x1xf32>
      %cst_40 = arith.constant 1.000000e+00 : f32
      %47 = vector.broadcast %cst_40 : f32 to vector<1x1xf32>
      %48 = arith.divf %47, %46 : vector<1x1xf32>
      %c0_41 = arith.constant 0 : index
      %c0_42 = arith.constant 0 : index
      %c0_43 = arith.constant 0 : index
      %49 = vector.load %arg9[%c0_41, %c0_42, %c0_43] : memref<1x1x1xf32, #tpu.memory_space<vmem>>, vector<1x1x1xf32>
      %50 = vector.shape_cast %49 : vector<1x1x1xf32> to vector<1x1xf32>
      %51 = vector.shape_cast %48 : vector<1x1xf32> to vector<1x1x1xf32>
      tpu.vector_store %arg9[%c0_41, %c0_42, %c0_43], %51 {strides = array<i32>} : memref<1x1x1xf32, #tpu.memory_space<vmem>>, vector<1x1x1xf32>,
    } else {
    }
    return
  }
  func.func @transform_0(%arg0: i32, %arg1: i32) -> (i32, i32, i32) {
    %c0_i32 = arith.constant 0 : i32
    %c0_i32_0 = arith.constant 0 : i32
    return %arg0, %c0_i32, %arg1 : i32, i32, i32
  }
  func.func @transform_1(%arg0: i32, %arg1: i32) -> (i32, i32, i32) {
    %c0_i32 = arith.constant 0 : i32
    %c0_i32_0 = arith.constant 0 : i32
    return %arg0, %c0_i32, %arg1 : i32, i32, i32
  }
  func.func @transform_2(%arg0: i32, %arg1: i32) -> (i32, i32) {
    %c0_i32 = arith.constant 0 : i32
    %c0_i32_0 = arith.constant 0 : i32
    %c0_i32_1 = arith.constant 0 : i32
    return %c0_i32, %c0_i32_0 : i32, i32
  }
  func.func @transform_3(%arg0: i32, %arg1: i32) -> (i32, i32) {
    %c0_i32 = arith.constant 0 : i32
    %c0_i32_0 = arith.constant 0 : i32
    %c0_i32_1 = arith.constant 0 : i32
    return %c0_i32, %c0_i32_0 : i32, i32
  }
  func.func @transform_4(%arg0: i32, %arg1: i32) -> (i32, i32) {
    %c0_i32 = arith.constant 0 : i32
    %c0_i32_0 = arith.constant 0 : i32
    %c0_i32_1 = arith.constant 0 : i32
    return %c0_i32, %c0_i32_0 : i32, i32
  }
  func.func @transform_5(%arg0: i32, %arg1: i32) -> (i32, i32) {
    %c0_i32 = arith.constant 0 : i32
    %c0_i32_0 = arith.constant 0 : i32
    %c0_i32_1 = arith.constant 0 : i32
    return %c0_i32, %c0_i32_0 : i32, i32
  }
  func.func @transform_6(%arg0: i32, %arg1: i32) -> (i32, i32) {
    %c0_i32 = arith.constant 0 : i32
    %c0_i32_0 = arith.constant 0 : i32
    %c0_i32_1 = arith.constant 0 : i32
    return %c0_i32, %c0_i32_0 : i32, i32
  }
  func.func @transform_7(%arg0: i32, %arg1: i32) -> (i32, i32, i32) {
    %c0_i32 = arith.constant 0 : i32
    %c0_i32_0 = arith.constant 0 : i32
    %c0_i32_1 = arith.constant 0 : i32
    return %arg0, %c0_i32, %c0_i32_0 : i32, i32, i32
  }
}

module attributes {stable_mosaic.version = 11 : i64} {
  func.func @_scale_kernel(%arg0: i32, %arg1: i32, %arg2: memref<2xf32, #tpu.memory_space<smem>>, %arg3: memref<1x8x576xf32, #tpu.memory_space<vmem>>, %arg4: memref<1x8x576xf32, #tpu.memory_space<vmem>>) attributes {dimension_semantics = [#tpu.dimension_semantics<parallel>, #tpu.dimension_semantics<parallel>], iteration_bounds = array<i64: 2, 1>, scalar_prefetch = 0 : i64, scratch_operands = 0 : i64, tpu.core_type = #tpu.core_type<tc>, window_params = [{transform_indices = @transform_0, window_bounds = array<i64: 2>}, {transform_indices = @transform_1, window_bounds = array<i64: 1, 8, 576>}, {transform_indices = @transform_2, window_bounds = array<i64: 1, 8, 576>}]} {
    %0 = arith.index_cast %arg0 : i32 to index
    %1 = memref.load %arg2[%0] : memref<2xf32, #tpu.memory_space<smem>>
    %c0 = arith.constant 0 : index
    %c0_0 = arith.constant 0 : index
    %c0_1 = arith.constant 0 : index
    %2 = vector.load %arg3[%c0, %c0_0, %c0_1] : memref<1x8x576xf32, #tpu.memory_space<vmem>>, vector<1x8x576xf32>
    %3 = vector.broadcast %1 : f32 to vector<1x8x576xf32>
    %4 = arith.mulf %2, %3 : vector<1x8x576xf32>
    %c0_2 = arith.constant 0 : index
    %c0_3 = arith.constant 0 : index
    %c0_4 = arith.constant 0 : index
    %5 = vector.load %arg4[%c0_2, %c0_3, %c0_4] : memref<1x8x576xf32, #tpu.memory_space<vmem>>, vector<1x8x576xf32>
    tpu.vector_store %arg4[%c0_2, %c0_3, %c0_4], %4 {strides = array<i32>} : memref<1x8x576xf32, #tpu.memory_space<vmem>>, vector<1x8x576xf32>,
    return
  }
  func.func @transform_0(%arg0: i32, %arg1: i32) -> i32 {
    %c0_i32 = arith.constant 0 : i32
    %c0_i32_0 = arith.constant 0 : i32
    return %c0_i32 : i32
  }
  func.func @transform_1(%arg0: i32, %arg1: i32) -> (i32, i32, i32) {
    %c0_i32 = arith.constant 0 : i32
    %c0_i32_0 = arith.constant 0 : i32
    return %arg0, %c0_i32, %arg1 : i32, i32, i32
  }
  func.func @transform_2(%arg0: i32, %arg1: i32) -> (i32, i32, i32) {
    %c0_i32 = arith.constant 0 : i32
    %c0_i32_0 = arith.constant 0 : i32
    return %arg0, %c0_i32, %arg1 : i32, i32, i32
  }
}

</mosaic_0001>

<bundles_post_ra>
// kernel: att_forward.2
= control target key start
LH: loop header
LB: loop body
LE: loop exit
PB: predicated region body
PF: predicated region fallthrough
CT: control target
= control target key end

     0   :  { %s1029_s26 = smov 0   ;;  %s1031_s27 = smov 0   ;;  %s1305_s0 = inlined_call_operand.vmem [shape: f32[2,8,576], index: 0, kind: input, shape index: {}]   ;;  %s1306_s1 = inlined_call_operand.vmem [shape: f32[2,24,576], index: 1, kind: input, shape index: {}]   ;;  %s1307_s2 = inlined_call_operand.vmem [shape: f32[128,8], index: 2, kind: input, shape index: {}]   ;;  %s1308_s3 = inlined_call_operand.vmem [shape: f32[128,24], index: 3, kind: input, shape index: {}]   ;;  %s1309_s4 = inlined_call_operand.vmem [shape: f32[128,1], index: 4, kind: input, shape index: {}]   ;;  %s1310_s5 = inlined_call_operand.vmem [shape: f32[1,128], index: 5, kind: input, shape index: {}]   ;;  %s1311_s6 = inlined_call_operand.<no memory space> [shape: f32[1,1], index: 6, kind: input, shape index: {}]   ;;  %s1312_s7 = inlined_call_operand.vmem [shape: f32[2,1,1], index: 7, kind: output, shape index: {}]  }
   0x1   :  { %v12_v0 = vstv %s1311_s6  ;;  %s1033_s28 = smov 0  }
   0x2   :  { %13 = vst [vmem:[#allocation4] sm:$0x1] %v12_v0 }
   0x3 LB: > { %s31_s6 = sadd.s32 1, %s979_s27  ;;  %p889_p0 = scmp.ge.s32.totalorder %s983_s28, 1  ;;  %s983_s28 = sphi %s1033_s28, %s19_s28   ;;  %s979_s27 = sphi %s1031_s27, %s1314_s27   ;;  %s975_s26 = sphi %s1029_s26, %s1313_s26  }
   0x4   : > { %p33_p1 = scmp.ge.s32.totalorder %s31_s6, 2  ;;  %p275_p2 = scmp.lt.s32.totalorder %s983_s28, 3 }
   0x6   : > { %s1316_s6 = smov (%p33_p1, %s31_s6), 0  ;;  %p276_p3 = pnand %p889_p0, %p275_p2 }
   0x7   : > { %p319_p4 = scmp.lt.s32.totalorder (!%p276_p3), %s975_s26, 1 }
   0x8   : > { %279 = sbr.rel (%p276_p3) target bundleno = 557 (0x22d), region = 48 }
   0xd   : > { %vm345_vm0 = vcmask 7168   ;;  %v985_v1 = vmov 0.0   ;;  %s1318_s26 = smov (!%p319_p4, %s975_s26), 1  ;;  %vm374_vm1 = vcmask 523264   ;;  %v423_v62 = vld [vmem:[%s1307_s2] sm:$0xff]  ;;  %vm569_vm2 = vcmask 64512  }
   0xe   : > { %349 = vst.msk [vmem:[#allocation3 + $0x10] sm:$0xff] %vm345_vm0, %v985_v1  ;;  %s931_s29 = smul.u32 120, %s1318_s26  ;;  %v447_v63 = vld [vmem:[%s1308_s3 + $0x40] sm:$0xff]  ;;  %vm455_vm3 = vcmask 195584   ;;  %v432_v0 = vld [vmem:[%s1307_s2 + $0x48] sm:$0xff]  ;;  %s340_s14 = scalar_lea.vmem %s1312_s7, %s1318_s26 }
   0xf   : > { %346 = vst.msk [vmem:[#allocation2] sm:$0xff] %vm345_vm0, %v985_v1  ;;  %s930_s30 = smul.u32 40, %s1318_s26 }
  0x10   : > { %347 = vst.msk [vmem:[#allocation3] sm:$0xff] %vm345_vm0, %v985_v1  ;;  %s1058_s10 = scalar_lea.vmem %s1306_s1, %s931_s29 }
  0x11   : > { %348 = vst.msk [vmem:[#allocation3 + $0x8] sm:$0xff] %vm345_vm0, %v985_v1  ;;  %v365_v2 = vld [vmem:[%s1058_s10 + $0x50] sm:$0xff]  ;;  %v366_v3 = vld [vmem:[%s1058_s10 + $0x58] sm:$0xff]  ;;  %v367_v4 = vld [vmem:[%s1058_s10 + $0x60] sm:$0xff]  ;;  %s326_s13 = scalar_lea.vmem %s1305_s0, %s930_s30 }
  0x12   : > { %v369_v5 = vld [vmem:[%s1058_s10 + $0x70] sm:$0xff]  ;;  %v399_v6 = vadd.f32 %v366_v3, %v365_v2  ;;  %v355_v7 = vld [vmem:[%s1058_s10] sm:$0xff]  ;;  %v368_v8 = vld [vmem:[%s1058_s10 + $0x68] sm:$0xff] }
  0x13   : > { %v356_v9 = vld [vmem:[%s1058_s10 + $0x8] sm:$0xff]  ;;  %v357_v10 = vld [vmem:[%s1058_s10 + $0x10] sm:$0xff]  ;;  %v359_v12 = vld [vmem:[%s1058_s10 + $0x20] sm:$0xff]  ;;  %v402_v16 = vsel %vm374_vm1, %v369_v5, 0.0 }
  0x14   : > { %v400_v11 = vadd.f32 %v399_v6, %v367_v4  ;;  %v385_v13 = vadd.f32 %v356_v9, %v355_v7  ;;  %v360_v14 = vld [vmem:[%s1058_s10 + $0x28] sm:$0xff]  ;;  %v361_v15 = vld [vmem:[%s1058_s10 + $0x30] sm:$0xff]  ;;  %v358_v17 = vld [vmem:[%s1058_s10 + $0x18] sm:$0xff]  ;;  %v388_v25 = vsel %vm374_vm1, %v359_v12, 0.0 }
  0x15   : > { %v362_v18 = vld [vmem:[%s1058_s10 + $0x38] sm:$0xff]  ;;  %v392_v19 = vadd.f32 %v361_v15, %v360_v14  ;;  %v350_v22 = vld [vmem:[%s326_s13] sm:$0xff]  ;;  %v351_v23 = vld [vmem:[%s326_s13 + $0x8] sm:$0xff] }
  0x16   : > { %v401_v20 = vadd.f32 %v400_v11, %v368_v8  ;;  %v386_v21 = vadd.f32 %v385_v13, %v357_v10  ;;  %v352_v24 = vld [vmem:[%s326_s13 + $0x10] sm:$0xff]  ;;  %v363_v26 = vld [vmem:[%s1058_s10 + $0x40] sm:$0xff]  ;;  %v371_v28 = vadd.f32 %v351_v23, %v350_v22  ;;  %v364_v31 = vld [vmem:[%s1058_s10 + $0x48] sm:$0xff] }
  0x17   : > { %v393_v27 = vadd.f32 %v392_v19, %v362_v18  ;;  %v353_v32 = vld [vmem:[%s326_s13 + $0x18] sm:$0xff]  ;;  %v354_v36 = vld [vmem:[%s326_s13 + $0x20] sm:$0xff]  ;;  %v395_v37 = vsel %vm374_vm1, %v364_v31, 0.0  ;;  %v382_v44 = vld [vmem:[#allocation3] sm:$0xff] }
  0x18   : > { %v403_v29 = vadd.f32 %v402_v16, %v401_v20  ;;  %v387_v30 = vadd.f32 %v386_v21, %v358_v17  ;;  %v372_v33 = vadd.f32 %v371_v28, %v352_v24  ;;  %v375_v39 = vsel %vm374_vm1, %v354_v36, 0.0  ;;  %v384_v42 = vld [vmem:[#allocation3 + $0x10] sm:$0xff]  ;;  %v383_v48 = vld [vmem:[#allocation3 + $0x8] sm:$0xff]  ;;  %v370_v50 = vld [vmem:[#allocation2] sm:$0xff] }
  0x19   : > { %v394_v35 = vadd.f32 %v393_v27, %v363_v26  ;;  %v439_v1 = vld [vmem:[%s1308_s3] sm:$0xff]  ;;  %v424_v2 = vld [vmem:[%s1307_s2 + $0x8] sm:$0xff]  ;;  %v433_v4 = vld [vmem:[%s1307_s2 + $0x50] sm:$0xff] }
  0x1a   : > { %404 = vadd.xlane.f32.xlu0 %v403_v29  ;;  %v389_v34 = vadd.f32 %v388_v25, %v387_v30  ;;  %v373_v38 = vadd.f32 %v372_v33, %v353_v32  ;;  %v448_v3 = vld [vmem:[%s1308_s3 + $0x48] sm:$0xff]  ;;  %v425_v6 = vld [vmem:[%s1307_s2 + $0x10] sm:$0xff]  ;;  %v434_v8 = vld [vmem:[%s1307_s2 + $0x58] sm:$0xff] }
  0x1b   : > { %v396_v40 = vadd.f32 %v395_v37, %v394_v35  ;;  %v440_v5 = vld [vmem:[%s1308_s3 + $0x8] sm:$0xff]  ;;  %v449_v7 = vld [vmem:[%s1308_s3 + $0x50] sm:$0xff]  ;;  %v426_v10 = vld [vmem:[%s1307_s2 + $0x18] sm:$0xff] }
  0x1c   : > { %390 = vadd.xlane.f32.xlu1 %v389_v34  ;;  %v376_v41 = vadd.f32 %v375_v39, %v373_v38  ;;  %v441_v9 = vld [vmem:[%s1308_s3 + $0x10] sm:$0xff]  ;;  %v450_v11 = vld [vmem:[%s1308_s3 + $0x58] sm:$0xff]  ;;  %v435_v12 = vld [vmem:[%s1307_s2 + $0x60] sm:$0xff] }
  0x1d   : > { %v442_v13 = vld [vmem:[%s1308_s3 + $0x18] sm:$0xff]  ;;  %v427_v14 = vld [vmem:[%s1307_s2 + $0x20] sm:$0xff]  ;;  %v436_v16 = vld [vmem:[%s1307_s2 + $0x68] sm:$0xff] }
  0x1e   : > { %v451_v15 = vld [vmem:[%s1308_s3 + $0x60] sm:$0xff]  ;;  %v428_v18 = vld [vmem:[%s1307_s2 + $0x28] sm:$0xff]  ;;  %v437_v20 = vld [vmem:[%s1307_s2 + $0x70] sm:$0xff] }
  0x1f   : > { %v443_v17 = vld [vmem:[%s1308_s3 + $0x20] sm:$0xff]  ;;  %v452_v19 = vld [vmem:[%s1308_s3 + $0x68] sm:$0xff]  ;;  %v429_v22 = vld [vmem:[%s1307_s2 + $0x30] sm:$0xff] }
  0x20   : > { %v444_v21 = vld [vmem:[%s1308_s3 + $0x28] sm:$0xff]  ;;  %v453_v23 = vld [vmem:[%s1308_s3 + $0x70] sm:$0xff]  ;;  %v438_v24 = vld [vmem:[%s1307_s2 + $0x78] sm:$0xff] }
  0x21   : > { %v445_v25 = vld [vmem:[%s1308_s3 + $0x30] sm:$0xff]  ;;  %v430_v26 = vld [vmem:[%s1307_s2 + $0x38] sm:$0xff]  ;;  %v431_v29 = vld [vmem:[%s1307_s2 + $0x40] sm:$0xff] }
  0x22   : > { %397 = vadd.xlane.f32.xlu0 %v396_v40  ;;  %v454_v27 = vld [vmem:[%s1308_s3 + $0x78] sm:$0xff] }
  0x23   : > { %v446_v28 = vld [vmem:[%s1308_s3 + $0x38] sm:$0xff] }
  0x24   : > { %377 = vadd.xlane.f32.xlu1 %v376_v41 }
  0x8d   : > { %v405_v43 = vpop.xlane.xlu0 %404 }
  0x8e   : > { %v408_v45 = vadd.f32 %v405_v43, %v384_v42 }
  0x8f   : > { %v391_v46 = vpop.xlane.xlu1 %390 }
  0x90   : > { %411 = vst.msk [vmem:[#allocation3 + $0x10] sm:$0xff] %vm345_vm0, %v408_v45  ;;  %v406_v47 = vadd.f32 %v391_v46, %v382_v44 }
  0x92   : > { %409 = vst.msk [vmem:[#allocation3] sm:$0xff] %vm345_vm0, %v406_v47 }
  0x95   : > { %v398_v49 = vpop.xlane.xlu0 %397 }
  0x96   : > { %v407_v51 = vadd.f32 %v398_v49, %v383_v48 }
  0x97   : > { %v378_v52 = vpop.xlane.xlu1 %377  ;;  %v419_v53 = vld [vmem:[#allocation3 + $0x10] sm:$0xff] }
  0x98   : > { %410 = vst.msk [vmem:[#allocation3 + $0x8] sm:$0xff] %vm345_vm0, %v407_v51  ;;  %v379_v54 = vadd.f32 %v378_v52, %v370_v50  ;;  %v422_v55 = vmul.f32 0.0017361111, %v419_v53 }
  0x99   : > { %v417_v56 = vld [vmem:[#allocation3] sm:$0xff] }
  0x9a   : > { %381 = vst.msk [vmem:[#allocation2] sm:$0xff] %vm345_vm0, %v379_v54  ;;  %517 = vmatpush.msra.mxu0 %v422_v55  ;;  %926 = vmatpush.msra.mxu3 %v422_v55  ;;  %v420_v59 = vmul.f32 0.0017361111, %v417_v56 }
  0x9f   : > { %v418_v57 = vld [vmem:[#allocation3 + $0x8] sm:$0xff] }
  0xa0   : > { %v421_v58 = vmul.f32 0.0017361111, %v418_v57 }
  0xa1   : > { %v415_v60 = vld [vmem:[#allocation2] sm:$0xff] }
  0xa2   : > { %518 = vmatpush.msra.mxu0 %v421_v58  ;;  %927 = vmatpush.msra.mxu3 %v421_v58  ;;  %v416_v61 = vmul.f32 0.0017361111, %v415_v60 }
  0xa4   : > { %633 = vmatpush.msra.mxu1 %v416_v61  ;;  %519 = vmatpush.msra.mxu0 %v420_v59 }
  0xa5   : > { %908 = vmatmul.msk.f32.vlgmr.msra.gmra.mxu1 %vm569_vm2, %v423_v62  ;;  %928 = vmatpush.msra.mxu3 %v420_v59  ;;  %v697_v59 = vld [vmem:[%s1309_s4 + $0x70] sm:$0xff] }
  0xa6   : > { %900 = vmatmul.msk.f32.vlgmr.msra.gmra.mxu3 %vm455_vm3, %v447_v63  ;;  %929 = vmatpush.msra.mxu2 %v416_v61  ;;  %v696_v63 = vld [vmem:[%s1309_s4 + $0x68] sm:$0xff] }
  0xa7   : > { %917 = vmatmul.msk.f32.vlgmr.msra.gmra.mxu2 %vm569_vm2, %v432_v0  ;;  %892 = vmatmul.msk.f32.vlgmr.msra.gmra.mxu0 %vm455_vm3, %v439_v1  ;;  %v698_v1 = vld [vmem:[%s1309_s4 + $0x78] sm:$0xff] }
  0xad   : > { %909 = vmatmul.msk.f32.gmra.mxu1 %vm569_vm2, %v424_v2 }
  0xae   : > { %901 = vmatmul.msk.f32.gmra.mxu3 %vm455_vm3, %v448_v3 }
  0xaf   : > { %918 = vmatmul.msk.f32.gmra.mxu2 %vm569_vm2, %v433_v4  ;;  %893 = vmatmul.msk.f32.gmra.mxu0 %vm455_vm3, %v440_v5  ;;  %v695_v5 = vld [vmem:[%s1309_s4 + $0x60] sm:$0xff] }
  0xb5   : > { %910 = vmatmul.msk.f32.gmra.mxu1 %vm569_vm2, %v425_v6 }
  0xb6   : > { %902 = vmatmul.msk.f32.gmra.mxu3 %vm455_vm3, %v449_v7 }
  0xb7   : > { %919 = vmatmul.msk.f32.gmra.mxu2 %vm569_vm2, %v434_v8  ;;  %894 = vmatmul.msk.f32.gmra.mxu0 %vm455_vm3, %v441_v9 }
  0xbd   : > { %911 = vmatmul.msk.f32.gmra.mxu1 %vm569_vm2, %v426_v10  ;;  %v694_v10 = vld [vmem:[%s1309_s4 + $0x58] sm:$0xff] }
  0xbe   : > { %903 = vmatmul.msk.f32.gmra.mxu3 %vm455_vm3, %v450_v11 }
  0xbf   : > { %920 = vmatmul.msk.f32.gmra.mxu2 %vm569_vm2, %v435_v12  ;;  %895 = vmatmul.msk.f32.gmra.mxu0 %vm455_vm3, %v442_v13 }
  0xc5   : > { %912 = vmatmul.msk.f32.gmra.mxu1 %vm569_vm2, %v427_v14  ;;  %v693_v14 = vld [vmem:[%s1309_s4 + $0x50] sm:$0xff] }
  0xc6   : > { %904 = vmatmul.msk.f32.gmra.mxu3 %vm455_vm3, %v451_v15 }
  0xc7   : > { %921 = vmatmul.msk.f32.gmra.mxu2 %vm569_vm2, %v436_v16  ;;  %896 = vmatmul.msk.f32.gmra.mxu0 %vm455_vm3, %v443_v17 }
  0xcd   : > { %913 = vmatmul.msk.f32.gmra.mxu1 %vm569_vm2, %v428_v18 }
  0xce   : > { %905 = vmatmul.msk.f32.gmra.mxu3 %vm455_vm3, %v452_v19 }
  0xcf   : > { %922 = vmatmul.msk.f32.gmra.mxu2 %vm569_vm2, %v437_v20  ;;  %897 = vmatmul.msk.f32.gmra.mxu0 %vm455_vm3, %v444_v21  ;;  %v692_v20 = vld [vmem:[%s1309_s4 + $0x48] sm:$0xff] }
  0xd5   : > { %914 = vmatmul.msk.f32.gmra.mxu1 %vm569_vm2, %v429_v22 }
  0xd6   : > { %906 = vmatmul.msk.f32.gmra.mxu3 %vm455_vm3, %v453_v23 }
  0xd7   : > { %923 = vmatmul.msk.f32.gmra.mxu2 %vm569_vm2, %v438_v24  ;;  %898 = vmatmul.msk.f32.gmra.mxu0 %vm455_vm3, %v445_v25 }
  0xdd   : > { %915 = vmatmul.msk.f32.gmra.mxu1 %vm569_vm2, %v430_v26  ;;  %v691_v26 = vld [vmem:[%s1309_s4 + $0x40] sm:$0xff] }
  0xde   : > { %907 = vmatmul.msk.f32.gmra.mxu3 %vm455_vm3, %v454_v27 }
  0xdf   : > { %899 = vmatmul.msk.f32.gmra.mxu0 %vm455_vm3, %v446_v28 }
  0xe5   : > { %916 = vmatmul.msk.f32.gmra.mxu1 %vm569_vm2, %v431_v29 }
 0x122   : > { %v635_v30 = vpop.f32.mrf.mxu1 }
 0x124   : > { %v521_v31 = vpop.f32.mrf.mxu0 }
 0x125   : > { %v1214_v32 = vadd.f32 %v635_v30, %v521_v31  ;;  %v690_v31 = vld [vmem:[%s1309_s4 + $0x38] sm:$0xff] }
 0x129   : > { %v545_v33 = vpop.f32.mrf.mxu3 }
 0x12a   : > { %v1216_v34 = vpop.f32.mrf.mxu1  ;;  %v662_v35 = vpop.f32.mrf.mxu2 }
 0x12c   : > { %v1218_v36 = vpop.f32.mrf.mxu0 }
 0x131   : > { %v548_v37 = vpop.f32.mrf.mxu3 }
 0x132   : > { %v1220_v38 = vpop.f32.mrf.mxu1  ;;  %v665_v39 = vpop.f32.mrf.mxu2  ;;  %v663_v16 = vadd.f32 %v662_v35, %v548_v37 }
 0x134   : > { %v1222_v40 = vpop.f32.mrf.mxu0  ;;  %v708_v27 = vadd.f32 %v692_v20, %v663_v16 }
 0x136   : > { %vm724_vm10 = vcmp.gt.f32.partialorder %v708_v27, 0.0 }
 0x139   : > { %v551_v41 = vpop.f32.mrf.mxu3 }
 0x13a   : > { %v1224_v42 = vpop.f32.mrf.mxu1  ;;  %v668_v43 = vpop.f32.mrf.mxu2  ;;  %v666_v9 = vadd.f32 %v665_v39, %v551_v41  ;;  %v689_v41 = vld [vmem:[%s1309_s4 + $0x30] sm:$0xff] }
 0x13c   : > { %v1226_v45 = vpop.f32.mrf.mxu0  ;;  %v709_v22 = vadd.f32 %v693_v14, %v666_v9  ;;  %v763_v14 = vld [vmem:[%s1310_s5] sm:$0x1] }
 0x13e   : > { %v741_v39 = vmul.f32 0.2, %v709_v22  ;;  %vm725_vm9 = vcmp.gt.f32.partialorder %v709_v22, 0.0 }
 0x141   : > { %v554_v44 = vpop.f32.mrf.mxu3 }
 0x142   : > { %v1228_v46 = vpop.f32.mrf.mxu1  ;;  %v671_v47 = vpop.f32.mrf.mxu2  ;;  %v669_v6 = vadd.f32 %v668_v43, %v554_v44 }
 0x144   : > { %v1230_v51 = vpop.f32.mrf.mxu0  ;;  %v710_v17 = vadd.f32 %v694_v10, %v669_v6 }
 0x146   : > { %v742_v30 = vmul.f32 0.2, %v710_v17  ;;  %vm726_vm8 = vcmp.gt.f32.partialorder %v710_v17, 0.0 }
 0x149   : > { %v557_v48 = vpop.f32.mrf.mxu3 }
 0x14a   : > { %v650_v49 = vpop.f32.mrf.mxu1  ;;  %v674_v50 = vpop.f32.mrf.mxu2  ;;  %v672_v2 = vadd.f32 %v671_v47, %v557_v48  ;;  %v758_v47 = vsel %vm726_vm8, %v710_v17, %v742_v30  ;;  %v740_v48 = vmul.f32 0.2, %v708_v27 }
 0x14c   : > { %v536_v55 = vpop.f32.mrf.mxu0  ;;  %v711_v11 = vadd.f32 %v695_v5, %v672_v2  ;;  %v684_v2 = vld [vmem:[%s1309_s4 + $0x8] sm:$0xff] }
 0x14d   : > { %v651_v43 = vadd.f32 %v650_v49, %v536_v55  ;;  %v645_v49 = vadd.f32 %v1224_v42, %v1226_v45  ;;  %v639_v42 = vadd.f32 %v1216_v34, %v1218_v36 }
 0x14e   : > { %v743_v25 = vmul.f32 0.2, %v711_v11  ;;  %vm727_vm7 = vcmp.gt.f32.partialorder %v711_v11, 0.0 }
 0x14f   : > { %v700_v5 = vadd.f32 %v684_v2, %v639_v42 }
 0x150   : > { %v759_v37 = vsel %vm727_vm7, %v711_v11, %v743_v25  ;;  %vm804_vm7 = vcmask 0  }
 0x151   : > { %v560_v52 = vpop.f32.mrf.mxu3  ;;  %v732_v10 = vmul.f32 0.2, %v700_v5  ;;  %vm716_vm2 = vcmp.gt.f32.partialorder %v700_v5, 0.0 }
 0x152   : > { %v653_v53 = vpop.f32.mrf.mxu1  ;;  %v677_v54 = vpop.f32.mrf.mxu2  ;;  %v675_v62 = vadd.f32 %v674_v50, %v560_v52  ;;  %v688_v50 = vld [vmem:[%s1309_s4 + $0x28] sm:$0xff]  ;;  %v648_v52 = vadd.f32 %v1228_v46, %v1230_v51  ;;  %v642_v46 = vadd.f32 %v1220_v38, %v1222_v40 }
 0x153   : > { %v704_v55 = vadd.f32 %v688_v50, %v651_v43 }
 0x154   : > { %v539_v61 = vpop.f32.mrf.mxu0  ;;  %v712_v7 = vadd.f32 %v696_v63, %v675_v62  ;;  %v685_v63 = vld [vmem:[%s1309_s4 + $0x10] sm:$0xff] }
 0x155   : > { %vm720_vm14 = vcmp.gt.f32.partialorder %v704_v55, 0.0  ;;  %v701_v38 = vadd.f32 %v685_v63, %v642_v46 }
 0x156   : > { %v744_v19 = vmul.f32 0.2, %v712_v7  ;;  %vm728_vm6 = vcmp.gt.f32.partialorder %v712_v7, 0.0 }
 0x157   : > { %vm717_vm1 = vcmp.gt.f32.partialorder %v701_v38, 0.0 }
 0x158   : > { %v760_v28 = vsel %vm728_vm6, %v712_v7, %v744_v19 }
 0x159   : > { %v563_v56 = vpop.f32.mrf.mxu3 }
 0x15a   : > { %v656_v57 = vpop.f32.mrf.mxu1  ;;  %v678_v58 = vadd.f32 %v677_v54, %v563_v56  ;;  %v680_v60 = vpop.f32.mrf.mxu2  ;;  %v757_v54 = vsel %vm725_vm9, %v709_v22, %v741_v39 }
 0x15c   : > { %v713_v3 = vadd.f32 %v697_v59, %v678_v58  ;;  %v542_v21 = vpop.f32.mrf.mxu0  ;;  %v756_v58 = vsel %vm724_vm10, %v708_v27, %v740_v48 }
 0x15d   : > { %v657_v29 = vadd.f32 %v656_v57, %v542_v21  ;;  %v687_v57 = vld [vmem:[%s1309_s4 + $0x20] sm:$0xff] }
 0x15e   : > { %v745_v13 = vmul.f32 0.2, %v713_v3  ;;  %vm729_vm5 = vcmp.gt.f32.partialorder %v713_v3, 0.0  ;;  %v703_v51 = vadd.f32 %v687_v57, %v648_v52 }
 0x15f   : > { %v706_v44 = vadd.f32 %v690_v31, %v657_v29 }
 0x160   : > { %v761_v24 = vsel %vm729_vm5, %v713_v3, %v745_v13  ;;  %v735_v3 = vmul.f32 0.2, %v703_v51  ;;  %vm719_vm15 = vcmp.gt.f32.partialorder %v703_v51, 0.0  ;;  %v748_v13 = vsel %vm716_vm2, %v700_v5, %v732_v10 }
 0x161   : > { %v566_v0 = vpop.f32.mrf.mxu3  ;;  %v738_v59 = vmul.f32 0.2, %v706_v44  ;;  %vm722_vm12 = vcmp.gt.f32.partialorder %v706_v44, 0.0 }
 0x162   : > { %v681_v4 = vadd.f32 %v680_v60, %v566_v0  ;;  %v659_v15 = vpop.f32.mrf.mxu1  ;;  %v686_v60 = vld [vmem:[%s1309_s4 + $0x18] sm:$0xff]  ;;  %v751_v7 = vsel %vm719_vm15, %v703_v51, %v735_v3 }
 0x163   : > { %v660_v23 = vadd.f32 %v659_v15, %v545_v33  ;;  %v654_v33 = vadd.f32 %v653_v53, %v539_v61  ;;  %v702_v45 = vadd.f32 %v686_v60, %v645_v49  ;;  %v754_v0 = vsel %vm722_vm12, %v706_v44, %v738_v59 }
 0x164   : > { %v714_v8 = vadd.f32 %v698_v1, %v681_v4  ;;  %v736_v1 = vmul.f32 0.2, %v704_v55  ;;  %v683_v4 = vld [vmem:[%s1309_s4] sm:$0xff] }
 0x165   : > { %v707_v35 = vadd.f32 %v691_v26, %v660_v23  ;;  %v705_v53 = vadd.f32 %v689_v41, %v654_v33  ;;  %v734_v36 = vmul.f32 0.2, %v702_v45  ;;  %vm718_vm0 = vcmp.gt.f32.partialorder %v702_v45, 0.0 }
 0x166   : > { %vm730_vm4 = vcmp.gt.f32.partialorder %v714_v8, 0.0  ;;  %v746_v12 = vmul.f32 0.2, %v714_v8  ;;  %v752_v34 = vsel %vm720_vm14, %v704_v55, %v736_v1  ;;  %v699_v6 = vadd.f32 %v683_v4, %v1214_v32  ;;  %v764_v32 = vld [vmem:[#allocation4] sm:$0x1] }
 0x167   : > { %v739_v56 = vmul.f32 0.2, %v707_v35  ;;  %vm723_vm11 = vcmp.gt.f32.partialorder %v707_v35, 0.0  ;;  %v737_v62 = vmul.f32 0.2, %v705_v53  ;;  %vm721_vm13 = vcmp.gt.f32.partialorder %v705_v53, 0.0 }
 0x168   : > { %v762_v18 = vsel %vm730_vm4, %v714_v8, %v746_v12  ;;  %v733_v8 = vmul.f32 0.2, %v701_v38  ;;  %v750_v9 = vsel %vm718_vm0, %v702_v45, %v734_v36  ;;  %v731_v12 = vmul.f32 0.2, %v699_v6 }
 0x169   : > { %765 = vmatpush.msrb.mxu2 %v762_v18  ;;  %v755_v61 = vsel %vm723_vm11, %v707_v35, %v739_v56  ;;  %v753_v40 = vsel %vm721_vm13, %v705_v53, %v737_v62  ;;  %vm715_vm3 = vcmp.gt.f32.partialorder %v699_v6, 0.0 }
 0x16a   : > { %v749_v11 = vsel %vm717_vm1, %v701_v38, %v733_v8  ;;  %v747_v15 = vsel %vm715_vm3, %v699_v6, %v731_v12 }
 0x16b   : > { %766 = vmatpush.msrb.mxu2 %v761_v24 }
 0x16d   : > { %767 = vmatpush.msrb.mxu2 %v760_v28 }
 0x16f   : > { %768 = vmatpush.msrb.mxu2 %v759_v37 }
 0x171   : > { %769 = vmatpush.msrb.mxu2 %v758_v47 }
 0x173   : > { %770 = vmatpush.msrb.mxu2 %v757_v54 }
 0x175   : > { %771 = vmatpush.msrb.mxu2 %v756_v58 }
 0x177   : > { %772 = vmatpush.msrb.mxu2 %v755_v61 }
 0x179   : > { %773 = vmatpush.msrb.mxu2 %v754_v0 }
 0x17b   : > { %774 = vmatpush.msrb.mxu2 %v753_v40 }
 0x17d   : > { %775 = vmatpush.msrb.mxu2 %v752_v34 }
 0x17f   : > { %776 = vmatpush.msrb.mxu2 %v751_v7 }
 0x181   : > { %777 = vmatpush.msrb.mxu2 %v750_v9 }
 0x183   : > { %778 = vmatpush.msrb.mxu2 %v749_v11 }
 0x185   : > { %779 = vmatpush.msrb.mxu2 %v748_v13 }
 0x187   : > { %780 = vmatpush.msrb.mxu2 %v747_v15 }
 0x188   : > { %781 = vmatmul.f32.vlgmr.msrb.gmra.mxu2 %v763_v14 }
 0x20b   : > { %v782_v16 = vpop.f32.mrf.mxu2 }
 0x20c   : > { %v783_v17 = vadd.f32 %v782_v16, %v764_v32 }
 0x20e   : > { %v785_v18 = vsub.f32 0.0, %v783_v17 }
 0x210   : > { %v786_v19 = vmul.f32 1.442695, %v785_v18 }
 0x212   : > { %957 = vpow2.f32 %v786_v19 }
 0x218   : > { %v958_v20 = vpop.eup %957 }
 0x219   : > { %v788_v21 = vadd.f32 1.0, %v958_v20 }
 0x21b   : > { %959 = vrcp.f32 %v788_v21  ;;  %v800_v25 = vand.u32 2147483648, %v788_v21  ;;  %v798_v27 = vand.u32 2147483647, %v788_v21  ;;  %vm794_vm5 = vweird.f32 %v788_v21 }
 0x21d   : > { %v801_v29 = vor.u32 1.1754944e-38, %v800_v25  ;;  %vm799_vm8 = vcmp.eq.f32.partialorder %v798_v27, 8.507059e+37 }
 0x221   : > { %v960_v22 = vpop.eup %959 }
 0x222   : > { %v790_v23 = vmul.f32 %v960_v22, %v788_v21  ;;  %vm795_vm4 = vweird.f32 %v960_v22 }
 0x223   : > { %vm796_vm6 = vmor %vm794_vm5, %vm795_vm4 }
 0x224   : > { %v791_v24 = vsub.f32 1.0, %v790_v23 }
 0x226   : > { %v792_v26 = vmul.f32 %v960_v22, %v791_v24 }
 0x228   : > { %v793_v28 = vadd.f32 %v960_v22, %v792_v26 }
 0x22a   : > { %v797_v30 = vsel %vm796_vm6, %v960_v22, %v793_v28 }
 0x22b   : > { %v802_v31 = vsel %vm799_vm8, %v801_v29, %v797_v30 }
 0x22c   : > { %805 = vst.msk [vmem:[%s340_s14] sm:$0x1] %vm804_vm7, %v802_v31 }
 0x22d PF: > { %s19_s28 = sadd.s32 1, %s983_s28   ;;  %s1313_s26 = smov %s979_s27 }
 0x22e   : > { %p16_p5 = scmp.ge.s32.totalorder %s19_s28, 4   ;;  %s1314_s27 = smov %s1316_s6 }
 0x230   :  { %18 = sbr.rel (!%p16_p5) target bundleno = 3 (0x3), region = 89 }

// kernel: att_forward.3
= control target key start
LH: loop header
LB: loop body
LE: loop exit
PB: predicated region body
PF: predicated region fallthrough
CT: control target
= control target key end

     0   :  { %7 = vsyncpa [#allocation3], 0  ;;  %s420_s9 = smov 0   ;;  %s422_s10 = smov 0   ;;  %s457_s0 = inlined_call_operand.vmem [shape: f32[2], index: 0, kind: input, shape index: {}]   ;;  %s458_s1 = inlined_call_operand.vmem [shape: f32[2,8,576], index: 1, kind: input, shape index: {}]   ;;  %s459_s2 = inlined_call_operand.vmem [shape: f32[2,8,576], index: 2, kind: output, shape index: {}]  }
   0x1   :  { %s424_s11 = smov 0  }
   0x2 LB: > { %s314_s12 = sadd.s32 4294967295, %s402_s11   ;;  %s25_s13 = sadd.s32 1, %s398_s10  ;;  %s402_s11 = sphi %s424_s11, %s13_s11   ;;  %s398_s10 = sphi %s422_s10, %s461_s10   ;;  %s394_s9 = sphi %s420_s9, %s460_s9  }
   0x3   : > { %p27_p0 = scmp.ge.s32.totalorder %s25_s13, 2  ;;  %p316_p1 = scmp.ge.s32.totalorder %s402_s11, 1 }
   0x4   : > { %p107_p2 = scmp.lt.s32.totalorder %s402_s11, 3  ;;  %p334_p4 = scmp.eq.s32.totalorder %s314_s12, 0 }
   0x5   : > { %s463_s13 = smov (%p27_p0, %s25_s13), 0  ;;  %s119_s16 = sshll.u32 %s457_s0, 4  ;;  %s120_s16 = int_to_ptr.vmem [resolvable:$true] %s119_s16 }
   0x6   : > { %p108_p3 = pnand %p316_p1, %p107_p2  ;;  %s404_s17 = smov [#allocation2]  }
   0x8   : > { %p330_p5 = pneg %p108_p3  ;;  %145 = sbr.rel (%p108_p3) target bundleno = 30 (0x1e), region = 28 }
   0xa   : > { %p331_p6 = pnand %p334_p4, %p330_p5 }
   0xc   : > { %333 = dma.vmem_to_smem (!%p331_p6), %s120_s16, 16, %s404_s17, [#allocation3]  }
   0xd   : > { %389 = dma.done.wait (%p334_p4), [#allocation3], 16  }
   0xe   : > { %391 = vsyncadd (%p334_p4), [#allocation3], 4294967280 }
   0xf   : > { %152 = sfence }
  0x10   : > { %p178_p7 = scmp.lt.s32.totalorder %s394_s9, 1  ;;  %s197_s18 = sld [smem:[#allocation2 + %s394_s9]]  ;;  %vm213_vm0 = vcmask 523264  }
  0x12   : > { %s465_s9 = smov (!%p178_p7, %s394_s9), 1 }
  0x13   : > { %s325_s19 = smul.u32 40, %s465_s9 }
  0x15   : > { %s185_s22 = scalar_lea.vmem %s458_s1, %s325_s19  ;;  %s195_s25 = scalar_lea.vmem %s459_s2, %s325_s19 }
  0x16   : > { %v203_v0 = vstv %s197_s18  ;;  %v198_v1 = vld [vmem:[%s185_s22] sm:$0xff]  ;;  %v199_v2 = vld [vmem:[%s185_s22 + $0x8] sm:$0xff]  ;;  %v200_v3 = vld [vmem:[%s185_s22 + $0x10] sm:$0xff] }
  0x17   : > { %v204_v4 = vmul.f32 %v203_v0, %v198_v1  ;;  %v205_v5 = vmul.f32 %v203_v0, %v199_v2  ;;  %v206_v6 = vmul.f32 %v203_v0, %v200_v3  ;;  %v201_v7 = vld [vmem:[%s185_s22 + $0x18] sm:$0xff]  ;;  %v202_v8 = vld [vmem:[%s185_s22 + $0x20] sm:$0xff] }
  0x18   : > { %v207_v9 = vmul.f32 %v203_v0, %v201_v7  ;;  %v208_v10 = vmul.f32 %v203_v0, %v202_v8 }
  0x19   : > { %209 = vst [vmem:[%s195_s25] sm:$0xff] %v204_v4 }
  0x1a   : > { %210 = vst [vmem:[%s195_s25 + $0x8] sm:$0xff] %v205_v5 }
  0x1b   : > { %211 = vst [vmem:[%s195_s25 + $0x10] sm:$0xff] %v206_v6 }
  0x1c   : > { %212 = vst [vmem:[%s195_s25 + $0x18] sm:$0xff] %v207_v9 }
  0x1d   : > { %214 = vst.msk [vmem:[%s195_s25 + $0x20] sm:$0xff] %vm213_vm0, %v208_v10 }
  0x1e PF: > { %s13_s11 = sadd.s32 1, %s402_s11   ;;  %s460_s9 = smov %s398_s10 }
  0x1f   : > { %p10_p8 = scmp.ge.s32.totalorder %s13_s11, 4   ;;  %s461_s10 = smov %s463_s13 }
  0x21   :  { %12 = sbr.rel (!%p10_p8) target bundleno = 2 (0x2), region = 63 }
  0x26   :  { %245 = vsyncpa [#allocation3], 1 }
  0x27   :  { %247 = vsyncpa [#allocation3 + $0x1], 1 }

</bundles_post_ra>
